<compile_context>
chip_gen: v6e
topology: v6e:2x2x1
jax: 0.10.0
libtpu: 0.0.40
codegen_flags: <defaults>
</compile_context>

<pallas_src>
import functools
import math

import jax
import jax.numpy as jnp
from jax.experimental import pallas as pl
from jax.experimental.pallas import tpu as pltpu


def _map_recon_kernel(x_ref, w_ref, b_ref, o_ref):
    # x_ref: (tm, P*C_in), w_ref: (P*C_in, P*C_out), b_ref: (1, P*C_out),
    # o_ref: (tm, P*C_out).  One MXU matmul + bias + sigmoid per row tile.
    acc = jnp.dot(x_ref[...], w_ref[...], preferred_element_type=jnp.float32)
    acc = acc + b_ref[...].astype(jnp.float32)        # broadcast bias over rows
    o_ref[...] = jax.nn.sigmoid(acc).astype(o_ref.dtype)


def _round_up(x, m):
    return ((x + m - 1) // m) * m


@functools.partial(jax.jit, static_argnames=("tm", "use_bf16"))
def map_reconstruction(x, w, b, *, tm=1024, use_bf16=False):
    """Pallas equivalent of MapReconstruction.forward.

    x: (B, S1, S2, C_in)  float32
    w: (C_in, C_out)      float32  (PyTorch stores (C_out, C_in); pass transposed)
    b: (C_out,)           float32
    returns (B, S1, S2, C_out)
    """
    B, S1, S2, c_in = x.shape
    c_in_w, c_out = w.shape
    assert c_in_w == c_in
    N = B * S1 * S2
    out_dtype = x.dtype

    # Lane-packing factor: output block last dim (P*c_out) becomes a multiple
    # of 128 lanes.  P == 1 automatically when 128 | c_out.
    P = 128 // math.gcd(c_out, 128)
    # Cap P if the double-buffered kron weight would eat too much VMEM
    # (relevant for wide layers, esp. v7x's 64 MiB).  Smaller P only costs
    # masked stores, never correctness.
    while P > 1 and 2 * (P * c_in) * (P * c_out) * 4 > 8 * 1024 * 1024:
        P //= 2

    # Pad the flattened input only when the packing reshape needs it
    # (N not divisible by P).  No whole-array padding for tile alignment.
    x_flat = x.reshape(N, c_in)
    N_pad = _round_up(N, P)
    if N_pad != N:
        x_flat = jnp.pad(x_flat, ((0, N_pad - N), (0, 0)))
    M = N_pad // P
    x_packed = x_flat.reshape(M, P * c_in)

    # Row tile: as large as possible for the HBM roofline (multiple of 8), but
    # split into >= 2 grid steps for mid/large problems so v7x's two
    # TensorCores both get work on the "parallel" row axis.
    tm = _round_up(max(tm, 8), 8)
    M8 = _round_up(M, 8)
    tm_eff = min(tm, M8)
    if M8 // tm_eff < 2 and M8 >= 512:
        tm_eff = max(256, _round_up(pl.cdiv(M8, 2), 8))
    num_steps = pl.cdiv(M, tm_eff)

    # Block-diagonal weight kron(I_P, w) and tiled bias; both VMEM-resident
    # across the whole grid (index_map always (0, 0)).
    w_big = jnp.kron(jnp.eye(P, dtype=w.dtype), w)
    b_big = jnp.tile(b, P).reshape(1, P * c_out)

    if use_bf16:
        # Halves the dominant (input-stream) HBM traffic; accumulate stays f32.
        x_packed = x_packed.astype(jnp.bfloat16)
        w_big = w_big.astype(jnp.bfloat16)

    in_isz = x_packed.dtype.itemsize
    w_isz = w_big.dtype.itemsize
    o_isz = jnp.dtype(out_dtype).itemsize

    # 3-deep pipelining on the streaming operands when there are enough grid
    # steps to benefit; resident weight/bias keep the default.
    if num_steps >= 3:
        x_spec = pl.BlockSpec((tm_eff, P * c_in), lambda i: (i, 0),
                              pipeline_mode=pl.Buffered(3))
        o_spec = pl.BlockSpec((tm_eff, P * c_out), lambda i: (i, 0),
                              pipeline_mode=pl.Buffered(3))
        n_buf = 3
    else:
        x_spec = pl.BlockSpec((tm_eff, P * c_in), lambda i: (i, 0))
        o_spec = pl.BlockSpec((tm_eff, P * c_out), lambda i: (i, 0))
        n_buf = 2

    cost = pl.CostEstimate(
        flops=2 * M * (P * c_in) * (P * c_out),
        transcendentals=M * P * c_out,
        bytes_accessed=(M * P * c_in * in_isz
                        + (P * c_in) * (P * c_out) * w_isz
                        + P * c_out * 4
                        + M * P * c_out * o_isz),
    )

    # Scoped-VMEM budget: pipelined buffers with 2x headroom, capped at 64 MiB
    # so the request is valid on every generation (v7x physical VMEM is 64 MiB).
    est_vmem = (n_buf * tm_eff * P * c_in * in_isz
                + n_buf * tm_eff * P * c_out * o_isz
                + 2 * (P * c_in) * (P * c_out) * w_isz
                + 2 * P * c_out * 4)
    vmem_limit = int(min(64 * 1024 * 1024, max(32 * 1024 * 1024, 2 * est_vmem)))

    out_packed = pl.pallas_call(
        _map_recon_kernel,
        out_shape=jax.ShapeDtypeStruct((M, P * c_out), out_dtype),
        grid_spec=pl.GridSpec(
            grid=(num_steps,),
            in_specs=[
                x_spec,                                                  # row tile
                pl.BlockSpec((P * c_in, P * c_out), lambda i: (0, 0)),   # weight (resident)
                pl.BlockSpec((1, P * c_out), lambda i: (0, 0)),          # bias (resident)
            ],
            out_specs=o_spec,
        ),
        compiler_params=pltpu.CompilerParams(
            dimension_semantics=("parallel",),
            vmem_limit_bytes=vmem_limit,
        ),
        cost_estimate=cost,
    )(x_packed, w_big, b_big)

    out_flat = out_packed.reshape(N_pad, c_out)[:N]
    return out_flat.reshape(B, S1, S2, c_out)


def reference(x, w, b):
    B, S1, S2, c_in = x.shape
    y = x.reshape(-1, c_in) @ w + b
    y = jax.nn.sigmoid(y)
    return y.reshape(B, S1, S2, w.shape[1])


if __name__ == "__main__":
    # Small shapes consistent with the module's forward:
    # x: (B, S1, S2, in_channels) -> out: (B, S1, S2, out_channels)
    B, S1, S2 = 2, 8, 8
    in_channels, out_channels = 32, 16

    key = jax.random.PRNGKey(0)
    kx, kw, kb = jax.random.split(key, 3)

    x = jax.random.normal(kx, (B, S1, S2, in_channels), dtype=jnp.float32)

    # Deterministic parameter init mimicking nn.Linear defaults
    # (uniform(-1/sqrt(fan_in), 1/sqrt(fan_in))).  Stored as (C_in, C_out).
    bound = 1.0 / jnp.sqrt(jnp.float32(in_channels))
    w = jax.random.uniform(kw, (in_channels, out_channels),
                           minval=-bound, maxval=bound, dtype=jnp.float32)
    b = jax.random.uniform(kb, (out_channels,),
                           minval=-bound, maxval=bound, dtype=jnp.float32)

    out = jax.block_until_ready(map_reconstruction(x, w, b))
    ref = reference(x, w, b)
    assert out.shape == (B, S1, S2, out_channels)
    assert jnp.allclose(out, ref, atol=1e-5, rtol=1e-5), "mismatch vs reference"

    # Ragged shape (not divisible by packing factor): exercises the minimal
    # N -> multiple-of-P pad and the masked partial last row-block.
    x2 = jax.random.normal(kx, (3, 7, 5, in_channels), dtype=jnp.float32)
    out2 = jax.block_until_ready(map_reconstruction(x2, w, b))
    assert jnp.allclose(out2, reference(x2, w, b), atol=1e-5, rtol=1e-5), "ragged mismatch"

    # Larger shape: multi-step grid (3 row tiles) -> exercises Buffered(3)
    # pipelining and the two-TensorCore split path.
    x3 = jax.random.normal(kx, (4, 96, 64, in_channels), dtype=jnp.float32)
    out3 = jax.block_until_ready(map_reconstruction(x3, w, b))
    assert jnp.allclose(out3, reference(x3, w, b), atol=1e-5, rtol=1e-5), "multi-tile mismatch"

    # Optional bf16 streaming path (f32 accumulate/sigmoid/output): looser tol.
    out4 = jax.block_until_ready(map_reconstruction(x, w, b, use_bf16=True))
    assert jnp.allclose(out4, ref, atol=2e-2, rtol=2e-2), "bf16 mismatch"

    print("KERNEL_OK")
</pallas_src>

<mosaic_0001>
module attributes {stable_mosaic.version = 11 : i64} {
  func.func @_map_recon_kernel(%arg0: i32, %arg1: memref<16x256xf32, #tpu.memory_space<vmem>>, %arg2: memref<256x128xf32, #tpu.memory_space<vmem>>, %arg3: memref<1x128xf32, #tpu.memory_space<vmem>>, %arg4: memref<16x128xf32, #tpu.memory_space<vmem>>) attributes {dimension_semantics = [#tpu.dimension_semantics<parallel>], iteration_bounds = array<i64: 1>, scalar_prefetch = 0 : i64, scratch_operands = 0 : i64, tpu.core_type = #tpu.core_type<tc>, window_params = [{transform_indices = @transform_0, window_bounds = array<i64: 16, 256>}, {pipeline_mode = #tpu.pipeline_mode<synchronous>, transform_indices = @transform_1, window_bounds = array<i64: 256, 128>}, {pipeline_mode = #tpu.pipeline_mode<synchronous>, transform_indices = @transform_2, window_bounds = array<i64: 1, 128>}, {transform_indices = @transform_3, window_bounds = array<i64: 16, 128>}]} {
    %c0 = arith.constant 0 : index
    %c0_0 = arith.constant 0 : index
    %0 = vector.load %arg1[%c0, %c0_0] : memref<16x256xf32, #tpu.memory_space<vmem>>, vector<16x256xf32>
    %c0_1 = arith.constant 0 : index
    %c0_2 = arith.constant 0 : index
    %1 = vector.load %arg2[%c0_1, %c0_2] : memref<256x128xf32, #tpu.memory_space<vmem>>, vector<256x128xf32>
    %cst = arith.constant dense<0.000000e+00> : vector<16x128xf32>
    %2 = tpu.matmul %0, %1, %cst {dimension_numbers = #tpu.dot_dimension_numbers<[1], [0], [0], [1], [0, 0, 1, 1], [], []>} : vector<16x256xf32>, vector<256x128xf32>, vector<16x128xf32> -> vector<16x128xf32>
    %c0_3 = arith.constant 0 : index
    %c0_4 = arith.constant 0 : index
    %3 = vector.load %arg3[%c0_3, %c0_4] : memref<1x128xf32, #tpu.memory_space<vmem>>, vector<1x128xf32>
    %4 = vector.broadcast %3 : vector<1x128xf32> to vector<16x128xf32>
    %5 = arith.addf %2, %4 : vector<16x128xf32>
    %6 = arith.negf %5 : vector<16x128xf32>
    %7 = math.exp %6 : vector<16x128xf32>
    %cst_5 = arith.constant 1.000000e+00 : f32
    %8 = vector.broadcast %cst_5 : f32 to vector<16x128xf32>
    %9 = arith.addf %8, %7 : vector<16x128xf32>
    %10 = arith.divf %8, %9 : vector<16x128xf32>
    %c0_6 = arith.constant 0 : index
    %c0_7 = arith.constant 0 : index
    %11 = vector.load %arg4[%c0_6, %c0_7] : memref<16x128xf32, #tpu.memory_space<vmem>>, vector<16x128xf32>
    tpu.vector_store %arg4[%c0_6, %c0_7], %10 {strides = array<i32>} : memref<16x128xf32, #tpu.memory_space<vmem>>, vector<16x128xf32>,
    return
  }
  func.func @transform_0(%arg0: i32) -> (i32, i32) {
    %c0_i32 = arith.constant 0 : i32
    %c0_i32_0 = arith.constant 0 : i32
    return %arg0, %c0_i32 : i32, i32
  }
  func.func @transform_1(%arg0: i32) -> (i32, i32) {
    %c0_i32 = arith.constant 0 : i32
    %c0_i32_0 = arith.constant 0 : i32
    %c0_i32_1 = arith.constant 0 : i32
    return %c0_i32, %c0_i32_0 : i32, i32
  }
  func.func @transform_2(%arg0: i32) -> (i32, i32) {
    %c0_i32 = arith.constant 0 : i32
    %c0_i32_0 = arith.constant 0 : i32
    %c0_i32_1 = arith.constant 0 : i32
    return %c0_i32, %c0_i32_0 : i32, i32
  }
  func.func @transform_3(%arg0: i32) -> (i32, i32) {
    %c0_i32 = arith.constant 0 : i32
    %c0_i32_0 = arith.constant 0 : i32
    return %arg0, %c0_i32 : i32, i32
  }
}

</mosaic_0001>

<bundles_post_ra>
// kernel: tile.8
= control target key start
LH: loop header
LB: loop body
LE: loop exit
PB: predicated region body
PF: predicated region fallthrough
CT: control target
= control target key end

     0   :  { %s22_s0 = inlined_call_operand.vmem [shape: f32[16], index: 0, kind: input, shape index: {}]   ;;  %s23_s1 = inlined_call_operand.vmem [shape: f32[8,16], index: 1, kind: output, shape index: {}]  }
   0x1   :  { %v4_v0 = vld [vmem:[%s22_s0] ss:$0 sm:$0xff] }
   0x2   :  { %5 = vst [vmem:[%s23_s1] sm:$0xff] %v4_v0 }

// kernel: tile.9
= control target key start
LH: loop header
LB: loop body
LE: loop exit
PB: predicated region body
PF: predicated region fallthrough
CT: control target
= control target key end

     0   :  { %s69_s10 = smov 112   ;;  %s70_s11 = smov 80   ;;  %vm3_vm0 = vcmask 130048   ;;  %vm9_vm1 = vcmask 1048448   ;;  %vm15_vm2 = vcmask 917248   ;;  %vm21_vm3 = vcmask 786048   ;;  %s113_s0 = inlined_call_operand.vmem [shape: f32[8,16], index: 0, kind: input, shape index: {}]   ;;  %s114_s1 = inlined_call_operand.vmem [shape: f32[1,128], index: 1, kind: output, shape index: {}]  }
   0x1   :  { %v55_v0 = vld [vmem:[%s113_s0 + $0x7] sm:$0x1]   ;;  %v57_v1 = vld [vmem:[%s113_s0 + $0x5] sm:$0x1]   ;;  %v56_v2 = vld [vmem:[%s113_s0 + $0x6] sm:$0x1]  }
   0x2   :  { %7 = vrot.lane.b32.xlu0 %v55_v0, %s69_s10  ;;  %19 = vrot.lane.b32.xlu1 %v57_v1, %s70_s11  ;;  %v58_v3 = vld [vmem:[%s113_s0 + $0x4] sm:$0x1]   ;;  %v2_v4 = vld [vmem:[%s113_s0] sm:$0x1]   ;;  %s71_s18 = smov 96   ;;  %s72_s19 = smov 64  }
   0x3   :  { %4 = vst.msk [vmem:[#allocation0] sm:$0x1] %vm3_vm0, %v2_v4   ;;  %v59_v5 = vld [vmem:[%s113_s0 + $0x3] sm:$0x1]   ;;  %v60_v6 = vld [vmem:[%s113_s0 + $0x2] sm:$0x1]  }
   0x4   :  { %s73_s24 = smov 48   ;;  %s74_s25 = smov 32   ;;  %v61_v7 = vld [vmem:[%s113_s0 + $0x1] sm:$0x1]   ;;  %vm27_vm4 = vcmask 654848   ;;  %vm33_vm5 = vcmask 523648  }
   0x5   :  { %s75_s0 = smov 16   ;;  %vm39_vm6 = vcmask 392448   ;;  %vm45_vm7 = vcmask 261248  }
   0x6   :  { %13 = vrot.lane.b32.xlu0 %v56_v2, %s71_s18  ;;  %25 = vrot.lane.b32.xlu1 %v58_v3, %s72_s19 }
   0xa   :  { %31 = vrot.lane.b32.xlu0 %v59_v5, %s73_s24  ;;  %37 = vrot.lane.b32.xlu1 %v60_v6, %s74_s25 }
   0xe   :  { %43 = vrot.lane.b32.xlu0 %v61_v7, %s75_s0 }
  0x74   :  { %v8_v8 = vpop.permute.xlu0 %7   ;;  %v20_v9 = vpop.permute.xlu1 %19  }
  0x75   :  { %10 = vst.msk [vmem:[#allocation0] sm:$0x1] %vm9_vm1, %v8_v8  }
  0x78   :  { %v14_v10 = vpop.permute.xlu0 %13   ;;  %v26_v11 = vpop.permute.xlu1 %25  }
  0x79   :  { %16 = vst.msk [vmem:[#allocation0] sm:$0x1] %vm15_vm2, %v14_v10  }
  0x7a   :  { %22 = vst.msk [vmem:[#allocation0] sm:$0x1] %vm21_vm3, %v20_v9  }
  0x7b   :  { %28 = vst.msk [vmem:[#allocation0] sm:$0x1] %vm27_vm4, %v26_v11  }
  0x7c   :  { %v32_v12 = vpop.permute.xlu0 %31   ;;  %v38_v13 = vpop.permute.xlu1 %37  }
  0x7d   :  { %34 = vst.msk [vmem:[#allocation0] sm:$0x1] %vm33_vm5, %v32_v12  }
  0x7e   :  { %40 = vst.msk [vmem:[#allocation0] sm:$0x1] %vm39_vm6, %v38_v13  }
  0x80   :  { %v44_v14 = vpop.permute.xlu0 %43  }
  0x81   :  { %46 = vst.msk [vmem:[#allocation0] sm:$0x1] %vm45_vm7, %v44_v14  }
  0x88   :  { %v51_v15 = vld [vmem:[#allocation0] sm:$0x1] }
  0x89   :  { %54 = vst [vmem:[%s114_s1] sm:$0x1] %v51_v15 }

// kernel: map_reconstruction.1
= control target key start
LH: loop header
LB: loop body
LE: loop exit
PB: predicated region body
PF: predicated region fallthrough
CT: control target
= control target key end

     0   :  { %s368_s1 = inlined_call_operand.vmem [shape: f32[256,128], index: 1, kind: input, shape index: {}]   ;;  %s369_s0 = inlined_call_operand.vmem [shape: f32[16,256], index: 0, kind: input, shape index: {}]   ;;  %s370_s2 = inlined_call_operand.vmem [shape: f32[1,128], index: 2, kind: input, shape index: {}]   ;;  %s371_s3 = inlined_call_operand.vmem [shape: f32[16,128], index: 3, kind: output, shape index: {}]  }
   0x1   :  { %v49_v0 = vld [vmem:[%s368_s1 + $0xf8] sm:$0xff]  ;;  %v48_v2 = vld [vmem:[%s368_s1 + $0xf0] sm:$0xff]  ;;  %v47_v4 = vld [vmem:[%s368_s1 + $0xe8] sm:$0xff] }
   0x2   :  { %v33_v1 = vld [vmem:[%s368_s1 + $0x78] sm:$0xff]  ;;  %153 = vmatprep.subr.mxu0 %v49_v0  ;;  %191 = vmatprep.subr.mxu1 %v49_v0  ;;  %v32_v3 = vld [vmem:[%s368_s1 + $0x70] sm:$0xff]  ;;  %v31_v5 = vld [vmem:[%s368_s1 + $0x68] sm:$0xff] }
   0x3   :  { %154 = vmatpush3.msra.mxu0 %v33_v1  ;;  %207 = vmatpush3.msra.mxu1 %v33_v1  ;;  %v46_v6 = vld [vmem:[%s368_s1 + $0xe0] sm:$0xff]  ;;  %v45_v8 = vld [vmem:[%s368_s1 + $0xd8] sm:$0xff]  ;;  %v44_v10 = vld [vmem:[%s368_s1 + $0xd0] sm:$0xff] }
   0x4   :  { %155 = vmatprep.subr.mxu0 %v48_v2  ;;  %192 = vmatprep.subr.mxu1 %v48_v2  ;;  %v30_v7 = vld [vmem:[%s368_s1 + $0x60] sm:$0xff]  ;;  %v29_v9 = vld [vmem:[%s368_s1 + $0x58] sm:$0xff]  ;;  %v28_v11 = vld [vmem:[%s368_s1 + $0x50] sm:$0xff] }
   0x5   :  { %156 = vmatpush3.msra.mxu0 %v32_v3  ;;  %208 = vmatpush3.msra.mxu1 %v32_v3  ;;  %v43_v12 = vld [vmem:[%s368_s1 + $0xc8] sm:$0xff]  ;;  %v42_v14 = vld [vmem:[%s368_s1 + $0xc0] sm:$0xff]  ;;  %v41_v16 = vld [vmem:[%s368_s1 + $0xb8] sm:$0xff] }
   0x6   :  { %157 = vmatprep.subr.mxu0 %v47_v4  ;;  %193 = vmatprep.subr.mxu1 %v47_v4  ;;  %v27_v13 = vld [vmem:[%s368_s1 + $0x48] sm:$0xff]  ;;  %v26_v15 = vld [vmem:[%s368_s1 + $0x40] sm:$0xff]  ;;  %v25_v17 = vld [vmem:[%s368_s1 + $0x38] sm:$0xff] }
   0x7   :  { %158 = vmatpush3.msra.mxu0 %v31_v5  ;;  %209 = vmatpush3.msra.mxu1 %v31_v5  ;;  %v40_v18 = vld [vmem:[%s368_s1 + $0xb0] sm:$0xff]  ;;  %v39_v20 = vld [vmem:[%s368_s1 + $0xa8] sm:$0xff]  ;;  %v38_v22 = vld [vmem:[%s368_s1 + $0xa0] sm:$0xff] }
   0x8   :  { %159 = vmatprep.subr.mxu0 %v46_v6  ;;  %194 = vmatprep.subr.mxu1 %v46_v6  ;;  %v24_v19 = vld [vmem:[%s368_s1 + $0x30] sm:$0xff]  ;;  %v23_v21 = vld [vmem:[%s368_s1 + $0x28] sm:$0xff]  ;;  %v22_v23 = vld [vmem:[%s368_s1 + $0x20] sm:$0xff] }
   0x9   :  { %160 = vmatpush3.msra.mxu0 %v30_v7  ;;  %210 = vmatpush3.msra.mxu1 %v30_v7  ;;  %v37_v24 = vld [vmem:[%s368_s1 + $0x98] sm:$0xff]  ;;  %v36_v26 = vld [vmem:[%s368_s1 + $0x90] sm:$0xff]  ;;  %v35_v28 = vld [vmem:[%s368_s1 + $0x88] sm:$0xff] }
   0xa   :  { %161 = vmatprep.subr.mxu0 %v45_v8  ;;  %195 = vmatprep.subr.mxu1 %v45_v8  ;;  %v21_v25 = vld [vmem:[%s368_s1 + $0x18] sm:$0xff]  ;;  %v20_v27 = vld [vmem:[%s368_s1 + $0x10] sm:$0xff]  ;;  %v19_v29 = vld [vmem:[%s368_s1 + $0x8] sm:$0xff] }
   0xb   :  { %162 = vmatpush3.msra.mxu0 %v29_v9  ;;  %211 = vmatpush3.msra.mxu1 %v29_v9  ;;  %v34_v30 = vld [vmem:[%s368_s1 + $0x80] sm:$0xff]  ;;  %v15_v32 = vld [vmem:[%s369_s0 + $0x8] sm:$0xff]  ;;  %v17_v33 = vld [vmem:[%s369_s0 + $0x18] sm:$0xff] }
   0xc   :  { %163 = vmatprep.subr.mxu0 %v44_v10  ;;  %196 = vmatprep.subr.mxu1 %v44_v10  ;;  %v18_v31 = vld [vmem:[%s368_s1] sm:$0xff]  ;;  %v16_v35 = vld [vmem:[%s369_s0 + $0x10] sm:$0xff] }
   0xd   :  { %164 = vmatpush3.msra.mxu0 %v28_v11  ;;  %212 = vmatpush3.msra.mxu1 %v28_v11  ;;  %v14_v34 = vld [vmem:[%s369_s0] sm:$0xff] }
   0xe   :  { %165 = vmatprep.subr.mxu0 %v43_v12  ;;  %197 = vmatprep.subr.mxu1 %v43_v12  ;;  %v150_v38 = vld [vmem:[%s370_s2] ss:$0 sm:$0xff] }
   0xf   :  { %166 = vmatpush3.msra.mxu0 %v27_v13  ;;  %213 = vmatpush3.msra.mxu1 %v27_v13 }
  0x10   :  { %167 = vmatprep.subr.mxu0 %v42_v14  ;;  %198 = vmatprep.subr.mxu1 %v42_v14 }
  0x11   :  { %168 = vmatpush3.msra.mxu0 %v26_v15  ;;  %214 = vmatpush3.msra.mxu1 %v26_v15 }
  0x12   :  { %169 = vmatprep.subr.mxu0 %v41_v16  ;;  %199 = vmatprep.subr.mxu1 %v41_v16 }
  0x13   :  { %170 = vmatpush3.msra.mxu0 %v25_v17  ;;  %215 = vmatpush3.msra.mxu1 %v25_v17 }
  0x14   :  { %171 = vmatprep.subr.mxu0 %v40_v18  ;;  %200 = vmatprep.subr.mxu1 %v40_v18 }
  0x15   :  { %172 = vmatpush3.msra.mxu0 %v24_v19  ;;  %216 = vmatpush3.msra.mxu1 %v24_v19 }
  0x16   :  { %173 = vmatprep.subr.mxu0 %v39_v20  ;;  %201 = vmatprep.subr.mxu1 %v39_v20 }
  0x17   :  { %174 = vmatpush3.msra.mxu0 %v23_v21  ;;  %217 = vmatpush3.msra.mxu1 %v23_v21 }
  0x18   :  { %175 = vmatprep.subr.mxu0 %v38_v22  ;;  %202 = vmatprep.subr.mxu1 %v38_v22 }
  0x19   :  { %176 = vmatpush3.msra.mxu0 %v22_v23  ;;  %218 = vmatpush3.msra.mxu1 %v22_v23 }
  0x1a   :  { %177 = vmatprep.subr.mxu0 %v37_v24  ;;  %203 = vmatprep.subr.mxu1 %v37_v24 }
  0x1b   :  { %178 = vmatpush3.msra.mxu0 %v21_v25  ;;  %219 = vmatpush3.msra.mxu1 %v21_v25 }
  0x1c   :  { %179 = vmatprep.subr.mxu0 %v36_v26  ;;  %204 = vmatprep.subr.mxu1 %v36_v26 }
  0x1d   :  { %180 = vmatpush3.msra.mxu0 %v20_v27  ;;  %220 = vmatpush3.msra.mxu1 %v20_v27 }
  0x1e   :  { %181 = vmatprep.subr.mxu0 %v35_v28  ;;  %205 = vmatprep.subr.mxu1 %v35_v28 }
  0x1f   :  { %182 = vmatpush3.msra.mxu0 %v19_v29  ;;  %221 = vmatpush3.msra.mxu1 %v19_v29 }
  0x20   :  { %183 = vmatprep.subr.mxu0 %v34_v30  ;;  %206 = vmatprep.subr.mxu1 %v34_v30 }
  0x21   :  { %184 = vmatpush3.msra.mxu0 %v18_v31  ;;  %222 = vmatpush3.msra.mxu1 %v18_v31 }
  0x22   :  { %121 = vmatprep.mubr.f32.mxu0 %v15_v32  ;;  %126 = vmatprep.mubr.f32.mxu1 %v17_v33 }
  0x23   :  { %122 = vmatmul.mubr.f32.vlgmr.msra.gmra.mxu0 %v14_v34  ;;  %127 = vmatmul.mubr.f32.vlgmr.msra.gmra.mxu1 %v16_v35 }
  0xe3   :  { %v185_v36 = vpop.f32.mrf.mxu0  ;;  %v188_v37 = vpop.f32.mrf.mxu1 }
  0xe5   :  { %v186_v39 = vpop.f32.mrf.mxu0  ;;  %v189_v40 = vpop.f32.mrf.mxu1 }
  0xe6   :  { %v187_v41 = vadd.f32 %v186_v39, %v185_v36  ;;  %v190_v42 = vadd.f32 %v189_v40, %v188_v37 }
  0xe8   :  { %v124_v43 = vadd.f32 %v187_v41, %v150_v38  ;;  %v129_v44 = vadd.f32 %v190_v42, %v150_v38 }
  0xea   :  { %v151_v45 = vmul.f32 -1.442695, %v124_v43  ;;  %v152_v46 = vmul.f32 -1.442695, %v129_v44 }
  0xec   :  { %223 = vpow2.f32 %v151_v45 }
  0xed   :  { %225 = vpow2.f32 %v152_v46 }
  0xf9   :  { %v224_v47 = vpop.eup %223 }
  0xfa   :  { %v226_v48 = vpop.eup %225  ;;  %v138_v49 = vadd.f32 1.0, %v224_v47 }
  0xfb   :  { %v139_v50 = vadd.f32 1.0, %v226_v48 }
  0xfc   :  { %227 = vrcp.f32 %v138_v49 }
  0xfd   :  { %229 = vrcp.f32 %v139_v50 }
 0x109   :  { %v228_v51 = vpop.eup %227 }
 0x10a   :  { %v230_v52 = vpop.eup %229  ;;  %144 = vst [vmem:[%s371_s3] sm:$0xff] %v228_v51 }
 0x10b   :  { %145 = vst [vmem:[%s371_s3 + $0x8] sm:$0xff] %v230_v52 }

</bundles_post_ra>
